<compile_context>
chip_gen: v5e
topology: v5e:2x2
jax: 0.10.0
libtpu: 0.0.40
codegen_flags: <defaults>
</compile_context>

<pallas_src>
import functools
import math

import numpy as np
import jax
import jax.numpy as jnp
from jax.experimental import pallas as pl
from jax.experimental.pallas import tpu as pltpu


# ----------------------------------------------------------------------------
# Host-side stencil construction (replaces findiff.FinDiff; pure numpy).
# ----------------------------------------------------------------------------
def _compositions(n, k):
    if n < 0 or k < 0:
        return
    elif k == 0:
        if n == 0:
            yield []
        return
    elif k == 1:
        yield [n]
        return
    else:
        for i in range(0, n + 1):
            for comp in _compositions(n - i, k - 1):
                yield [i] + comp


def _generate_list_of_derivatives(num_dims=2, max_order=2):
    derivatives = []
    for i in range(1, max_order + 1):
        derivatives += list(_compositions(i, num_dims))
    return derivatives


def _central_fd_coeffs_1d(order, acc):
    """Central finite-difference coefficients {offset: coeff} for d^order/dx^order."""
    if order == 0:
        return {0: 1.0}
    p = (order + 1) // 2 - 1 + acc // 2
    offsets = np.arange(-p, p + 1, dtype=np.float64)
    # Solve sum_j c_j * offsets[j]**k = order! * delta(k, order),  k = 0..2p
    a_mat = np.vstack([offsets ** k for k in range(2 * p + 1)])
    rhs = np.zeros(2 * p + 1)
    rhs[order] = math.factorial(order)
    coeffs = np.linalg.solve(a_mat, rhs)
    return {int(o): float(v)
            for o, v in zip(range(-p, p + 1), coeffs) if abs(v) > 1e-10}


def _stencil_2d(deriv, dx, acc):
    """2-D central stencil {(p0, p1): coeff} for mixed derivative (o0, o1)."""
    c0 = _central_fd_coeffs_1d(deriv[0], acc)
    c1 = _central_fd_coeffs_1d(deriv[1], acc)
    scale = 1.0 / (dx[0] ** deriv[0] * dx[1] ** deriv[1])
    return {(p0, p1): v0 * v1 * scale
            for p0, v0 in c0.items() for p1, v1 in c1.items()}


# ----------------------------------------------------------------------------
# Pallas kernel: all derivatives of a (tile_n, H*W) row tile, VMEM-resident.
# ----------------------------------------------------------------------------
def _grid_stencil_kernel(x_ref, o_ref, *, H, W, tap_groups, num_derivs):
    HW = H * W
    xf = x_ref[...].astype(jnp.float32)          # (tile_n, H*W), lanes = H*W

    def lroll(v, shift):
        # y[:, i] = v[:, (i - shift) % HW]  (jnp.roll semantics, static shift)
        s = shift % HW
        if s == 0:
            return v
        return pltpu.roll(v, s, axis=1)          # XLU lane rotation

    accs = [None] * num_derivs

    # tap_groups: ((dw, ((dh, ((d, coef), ...)), ...)), ...) with dw == 0 last
    # so the wrap mask / xf drop out of the live set in the final group.
    for dw, dh_list in tap_groups:
        if dw == 0:
            col = xf
        else:
            # Column-shifted base x[h, (w+dw)%W], built once per distinct dw:
            # flat lane roll + wrap-row fixup selected with an iota mask.
            lane_idx = jax.lax.broadcasted_iota(jnp.int32, xf.shape, 1)
            if W & (W - 1) == 0:                 # power-of-two fast path
                w_idx = lane_idx & (W - 1)
            else:
                w_idx = lane_idx % W
            main = lroll(xf, -dw)
            if dw > 0:
                col = jnp.where(w_idx >= W - dw, lroll(xf, W - dw), main)
            else:
                col = jnp.where(w_idx < -dw, lroll(xf, -(W + dw)), main)
        for dh, contribs in dh_list:
            # Whole-row shift == exact flat roll of the lane axis by dh*W.
            v = col if dh == 0 else lroll(col, -dh * W)
            for d, coef in contribs:             # fold tap into its accumulators
                term = jnp.float32(coef) * v
                accs[d] = term if accs[d] is None else accs[d] + term

    for d in range(num_derivs):
        acc = accs[d] if accs[d] is not None else jnp.zeros_like(xf)
        # Lane-dense store: output row layout is [d0 | d1 | ... | d_{D-1}].
        o_ref[:, d * HW:(d + 1) * HW] = acc.astype(o_ref.dtype)


# ----------------------------------------------------------------------------
# Module wrapper (mirrors the PyTorch GridStencil forward).
# ----------------------------------------------------------------------------
class GridStencilPallas:
    def __init__(self, input_dim, spatial_dim=2, max_order=2,
                 dx=(1.0, 1.0), accuracy=1):
        if spatial_dim != 2:
            raise NotImplementedError("Only spatial_dim=2 (conv2d) is supported.")
        self.input_dim = input_dim
        self.spatial_dim = spatial_dim
        self.max_order = max_order
        self.dx = tuple(dx)
        self.accuracy = accuracy
        self.list_of_derivative_orders = _generate_list_of_derivatives(
            num_dims=spatial_dim, max_order=max_order)
        self.num_derivatives = len(self.list_of_derivative_orders)
        self.list_of_stencils = [
            _stencil_2d(deriv, self.dx, acc=2 * accuracy)
            for deriv in self.list_of_derivative_orders
        ]
        self.filter_size = max(
            max(max(abs(p) for p in pos) for pos in st)
            for st in self.list_of_stencils)

        # Compile-time tap plan: distinct (dh, dw) taps -> [(derivative, coeff)],
        # grouped by dw (dw == 0 last) for tap-outer accumulation in the kernel.
        tap_to_contribs = {}
        for d, st in enumerate(self.list_of_stencils):
            for (dh, dw), coef in st.items():
                tap_to_contribs.setdefault((dh, dw), []).append((d, float(coef)))
        groups = {}
        for (dh, dw), contribs in tap_to_contribs.items():
            groups.setdefault(dw, []).append((dh, tuple(contribs)))
        dws = sorted(dw for dw in groups if dw != 0) + ([0] if 0 in groups else [])
        self.tap_groups = tuple(
            (dw, tuple(sorted(groups[dw], key=lambda t: t[0]))) for dw in dws)

    def _choose_tile_n(self, BC, HW, itemsize):
        """Row-tile size: multiple of 8, vreg- and VMEM-budgeted, >=2 grid steps."""
        D = self.num_derivatives
        if BC <= 8:
            return BC
        # (1) vreg pressure: ~(D + 4) live tile-sized f32 values, keep <= ~48 vregs.
        live = D + 4
        t_reg = max(8, (48 * 1024 // (live * HW)) // 8 * 8)
        # (2) VMEM budget: double-buffered input + output blocks <= 16 MiB
        #     (well under v5e/v6e scoped defaults and v7x's 64 MiB physical VMEM).
        budget = 16 * 1024 * 1024
        t_vmem = max(8, (budget // (2 * (1 + D) * HW * itemsize)) // 8 * 8)
        t = min(64, t_reg, t_vmem)
        # (3) >= 2 grid steps whenever possible: lets v7x's two TensorCores split
        #     the "parallel" row axis and gives the pipeline something to overlap.
        if BC >= 16:
            t = min(t, max(8, (BC // 2) // 8 * 8))
        return max(8, t)

    def __call__(self, x):
        B, C, H, W = x.shape
        assert C == self.input_dim
        assert self.filter_size < H and self.filter_size < W
        D = self.num_derivatives
        HW = H * W
        BC = B * C

        # Lane-dense flat layout: rows = (b, c), lanes = flattened (h, w).
        x_flat = x.reshape(BC, HW)

        tile_n = self._choose_tile_n(BC, HW, x.dtype.itemsize)
        grid = (pl.cdiv(BC, tile_n),)

        nnz = sum(len(st) for st in self.list_of_stencils)
        cost = pl.CostEstimate(
            flops=2 * nnz * BC * HW,
            transcendentals=0,
            bytes_accessed=(BC * HW + BC * D * HW) * x.dtype.itemsize,
        )

        kernel = functools.partial(
            _grid_stencil_kernel, H=H, W=W,
            tap_groups=self.tap_groups, num_derivs=D)

        out_flat = pl.pallas_call(
            kernel,
            out_shape=jax.ShapeDtypeStruct((BC, D * HW), x.dtype),
            grid=grid,
            in_specs=[pl.BlockSpec((tile_n, HW), lambda i: (i, 0))],
            out_specs=pl.BlockSpec((tile_n, D * HW), lambda i: (i, 0)),
            compiler_params=pltpu.CompilerParams(
                dimension_semantics=("parallel",)),
            cost_estimate=cost,
        )(x_flat)

        # (BC, D*HW) -> (B, C*D, H, W): purely contiguous reshape, no transpose.
        return out_flat.reshape(B, C * D, H, W)


# ----------------------------------------------------------------------------
# Pure-JAX reference (circular shifts in NCHW space) for correctness checking.
# ----------------------------------------------------------------------------
def _reference_forward(module, x):
    B, C, H, W = x.shape
    outs = []
    for c in range(C):
        for st in module.list_of_stencils:
            acc = jnp.zeros((B, H, W), x.dtype)
            for (p0, p1), v in st.items():
                acc = acc + v * jnp.roll(x[:, c], shift=(-p0, -p1), axis=(1, 2))
            outs.append(acc)
    return jnp.stack(outs, axis=1)            # (B, C*D, H, W)


if __name__ == "__main__":
    key = jax.random.PRNGKey(0)
    B, C, H, W = 2, 4, 16, 16
    x = jax.random.normal(key, (B, C, H, W), jnp.float32)

    module = GridStencilPallas(input_dim=C, spatial_dim=2, max_order=2,
                               dx=[1.0, 1.0], accuracy=1)

    fwd = jax.jit(module.__call__)
    out = jax.block_until_ready(fwd(x))

    D = module.num_derivatives                 # 5: d/dy, d/dx, d2/dy2, d2/dxdy, d2/dx2
    assert out.shape == (B, C * D, H, W), out.shape
    assert bool(jnp.all(jnp.isfinite(out)))

    ref = _reference_forward(module, x)
    np.testing.assert_allclose(np.asarray(out), np.asarray(ref),
                               rtol=1e-4, atol=1e-4)

    print("KERNEL_OK")
</pallas_src>

<mosaic_0001>
module attributes {stable_mosaic.version = 11 : i64} {
  func.func @_grid_stencil_kernel(%arg0: i32, %arg1: memref<8x256xf32, #tpu.memory_space<vmem>>, %arg2: memref<8x1280xf32, #tpu.memory_space<vmem>>) attributes {dimension_semantics = [#tpu.dimension_semantics<parallel>], iteration_bounds = array<i64: 1>, scalar_prefetch = 0 : i64, scratch_operands = 0 : i64, tpu.core_type = #tpu.core_type<tc>, window_params = [{transform_indices = @transform_0, window_bounds = array<i64: 8, 256>}, {transform_indices = @transform_1, window_bounds = array<i64: 8, 1280>}]} {
    %c0 = arith.constant 0 : index
    %c0_0 = arith.constant 0 : index
    %0 = vector.load %arg1[%c0, %c0_0] : memref<8x256xf32, #tpu.memory_space<vmem>>, vector<8x256xf32>
    %1 = tpu.iota {dimensions = array<i32: 1>} : vector<8x256xi32>
    %c15_i32 = arith.constant 15 : i32
    %2 = vector.broadcast %c15_i32 : i32 to vector<8x256xi32>
    %3 = arith.andi %1, %2 : vector<8x256xi32>
    %c1_i32 = arith.constant 1 : i32
    %4 = tpu.dynamic_rotate %0 by %c1_i32 dim 1 : vector<8x256xf32>, i32 -> vector<8x256xf32>
    %c1_i32_1 = arith.constant 1 : i32
    %5 = vector.broadcast %c1_i32_1 : i32 to vector<8x256xi32>
    %6 = arith.cmpi slt, %3, %5 : vector<8x256xi32>
    %c241_i32 = arith.constant 241 : i32
    %7 = tpu.dynamic_rotate %0 by %c241_i32 dim 1 : vector<8x256xf32>, i32 -> vector<8x256xf32>
    %8 = arith.select %6, %7, %4 : vector<8x256xi1>, vector<8x256xf32>
    %c16_i32 = arith.constant 16 : i32
    %9 = tpu.dynamic_rotate %8 by %c16_i32 dim 1 : vector<8x256xf32>, i32 -> vector<8x256xf32>
    %cst = arith.constant 2.500000e-01 : f32
    %10 = vector.broadcast %cst : f32 to vector<8x256xf32>
    %11 = arith.mulf %10, %9 : vector<8x256xf32>
    %cst_2 = arith.constant -5.000000e-01 : f32
    %12 = vector.broadcast %cst_2 : f32 to vector<8x256xf32>
    %13 = arith.mulf %12, %8 : vector<8x256xf32>
    %cst_3 = arith.constant 1.000000e+00 : f32
    %14 = vector.broadcast %cst_3 : f32 to vector<8x256xf32>
    %15 = arith.mulf %14, %8 : vector<8x256xf32>
    %c240_i32 = arith.constant 240 : i32
    %16 = tpu.dynamic_rotate %8 by %c240_i32 dim 1 : vector<8x256xf32>, i32 -> vector<8x256xf32>
    %cst_4 = arith.constant -2.500000e-01 : f32
    %17 = vector.broadcast %cst_4 : f32 to vector<8x256xf32>
    %18 = arith.mulf %17, %16 : vector<8x256xf32>
    %19 = arith.addf %11, %18 : vector<8x256xf32>
    %20 = tpu.iota {dimensions = array<i32: 1>} : vector<8x256xi32>
    %c15_i32_5 = arith.constant 15 : i32
    %21 = vector.broadcast %c15_i32_5 : i32 to vector<8x256xi32>
    %22 = arith.andi %20, %21 : vector<8x256xi32>
    %c255_i32 = arith.constant 255 : i32
    %23 = tpu.dynamic_rotate %0 by %c255_i32 dim 1 : vector<8x256xf32>, i32 -> vector<8x256xf32>
    %c15_i32_6 = arith.constant 15 : i32
    %24 = vector.broadcast %c15_i32_6 : i32 to vector<8x256xi32>
    %25 = arith.cmpi sge, %22, %24 : vector<8x256xi32>
    %c15_i32_7 = arith.constant 15 : i32
    %26 = tpu.dynamic_rotate %0 by %c15_i32_7 dim 1 : vector<8x256xf32>, i32 -> vector<8x256xf32>
    %27 = arith.select %25, %26, %23 : vector<8x256xi1>, vector<8x256xf32>
    %c16_i32_8 = arith.constant 16 : i32
    %28 = tpu.dynamic_rotate %27 by %c16_i32_8 dim 1 : vector<8x256xf32>, i32 -> vector<8x256xf32>
    %cst_9 = arith.constant -2.500000e-01 : f32
    %29 = vector.broadcast %cst_9 : f32 to vector<8x256xf32>
    %30 = arith.mulf %29, %28 : vector<8x256xf32>
    %31 = arith.addf %19, %30 : vector<8x256xf32>
    %cst_10 = arith.constant 5.000000e-01 : f32
    %32 = vector.broadcast %cst_10 : f32 to vector<8x256xf32>
    %33 = arith.mulf %32, %27 : vector<8x256xf32>
    %34 = arith.addf %13, %33 : vector<8x256xf32>
    %cst_11 = arith.constant 1.000000e+00 : f32
    %35 = vector.broadcast %cst_11 : f32 to vector<8x256xf32>
    %36 = arith.mulf %35, %27 : vector<8x256xf32>
    %37 = arith.addf %15, %36 : vector<8x256xf32>
    %c240_i32_12 = arith.constant 240 : i32
    %38 = tpu.dynamic_rotate %27 by %c240_i32_12 dim 1 : vector<8x256xf32>, i32 -> vector<8x256xf32>
    %cst_13 = arith.constant 2.500000e-01 : f32
    %39 = vector.broadcast %cst_13 : f32 to vector<8x256xf32>
    %40 = arith.mulf %39, %38 : vector<8x256xf32>
    %41 = arith.addf %31, %40 : vector<8x256xf32>
    %c16_i32_14 = arith.constant 16 : i32
    %42 = tpu.dynamic_rotate %0 by %c16_i32_14 dim 1 : vector<8x256xf32>, i32 -> vector<8x256xf32>
    %cst_15 = arith.constant -5.000000e-01 : f32
    %43 = vector.broadcast %cst_15 : f32 to vector<8x256xf32>
    %44 = arith.mulf %43, %42 : vector<8x256xf32>
    %cst_16 = arith.constant 1.000000e+00 : f32
    %45 = vector.broadcast %cst_16 : f32 to vector<8x256xf32>
    %46 = arith.mulf %45, %42 : vector<8x256xf32>
    %cst_17 = arith.constant -2.000000e+00 : f32
    %47 = vector.broadcast %cst_17 : f32 to vector<8x256xf32>
    %48 = arith.mulf %47, %0 : vector<8x256xf32>
    %49 = arith.addf %37, %48 : vector<8x256xf32>
    %cst_18 = arith.constant -2.000000e+00 : f32
    %50 = vector.broadcast %cst_18 : f32 to vector<8x256xf32>
    %51 = arith.mulf %50, %0 : vector<8x256xf32>
    %52 = arith.addf %46, %51 : vector<8x256xf32>
    %c240_i32_19 = arith.constant 240 : i32
    %53 = tpu.dynamic_rotate %0 by %c240_i32_19 dim 1 : vector<8x256xf32>, i32 -> vector<8x256xf32>
    %cst_20 = arith.constant 5.000000e-01 : f32
    %54 = vector.broadcast %cst_20 : f32 to vector<8x256xf32>
    %55 = arith.mulf %54, %53 : vector<8x256xf32>
    %56 = arith.addf %44, %55 : vector<8x256xf32>
    %cst_21 = arith.constant 1.000000e+00 : f32
    %57 = vector.broadcast %cst_21 : f32 to vector<8x256xf32>
    %58 = arith.mulf %57, %53 : vector<8x256xf32>
    %59 = arith.addf %52, %58 : vector<8x256xf32>
    %c0_22 = arith.constant 0 : index
    %c0_23 = arith.constant 0 : index
    %60 = vector.load %arg2[%c0_22, %c0_23] : memref<8x1280xf32, #tpu.memory_space<vmem>>, vector<8x256xf32>
    tpu.vector_store %arg2[%c0_22, %c0_23], %34 {strides = array<i32>} : memref<8x1280xf32, #tpu.memory_space<vmem>>, vector<8x256xf32>,
    %c0_24 = arith.constant 0 : index
    %c256 = arith.constant 256 : index
    %61 = vector.load %arg2[%c0_24, %c256] : memref<8x1280xf32, #tpu.memory_space<vmem>>, vector<8x256xf32>
    tpu.vector_store %arg2[%c0_24, %c256], %56 {strides = array<i32>} : memref<8x1280xf32, #tpu.memory_space<vmem>>, vector<8x256xf32>,
    %c0_25 = arith.constant 0 : index
    %c512 = arith.constant 512 : index
    %62 = vector.load %arg2[%c0_25, %c512] : memref<8x1280xf32, #tpu.memory_space<vmem>>, vector<8x256xf32>
    tpu.vector_store %arg2[%c0_25, %c512], %49 {strides = array<i32>} : memref<8x1280xf32, #tpu.memory_space<vmem>>, vector<8x256xf32>,
    %c0_26 = arith.constant 0 : index
    %c768 = arith.constant 768 : index
    %63 = vector.load %arg2[%c0_26, %c768] : memref<8x1280xf32, #tpu.memory_space<vmem>>, vector<8x256xf32>
    tpu.vector_store %arg2[%c0_26, %c768], %41 {strides = array<i32>} : memref<8x1280xf32, #tpu.memory_space<vmem>>, vector<8x256xf32>,
    %c0_27 = arith.constant 0 : index
    %c1024 = arith.constant 1024 : index
    %64 = vector.load %arg2[%c0_27, %c1024] : memref<8x1280xf32, #tpu.memory_space<vmem>>, vector<8x256xf32>
    tpu.vector_store %arg2[%c0_27, %c1024], %59 {strides = array<i32>} : memref<8x1280xf32, #tpu.memory_space<vmem>>, vector<8x256xf32>,
    return
  }
  func.func @transform_0(%arg0: i32) -> (i32, i32) {
    %c0_i32 = arith.constant 0 : i32
    %c0_i32_0 = arith.constant 0 : i32
    return %arg0, %c0_i32 : i32, i32
  }
  func.func @transform_1(%arg0: i32) -> (i32, i32) {
    %c0_i32 = arith.constant 0 : i32
    %c0_i32_0 = arith.constant 0 : i32
    return %arg0, %c0_i32 : i32, i32
  }
}

</mosaic_0001>

<bundles_post_ra>
// kernel: a_call__.1
= control target key start
LH: loop header
LB: loop body
LE: loop exit
PB: predicated region body
PF: predicated region fallthrough
CT: control target
= control target key end

     0   :  { %s145_s8 = smov 113   ;;  %s146_s9 = smov 1   ;;  %v10_v2 = vlaneseq  ;;  %s269_s0 = inlined_call_operand.vmem [shape: f32[8,256], index: 0, kind: input, shape index: {}]   ;;  %s270_s1 = inlined_call_operand.vmem [shape: f32[8,1280], index: 1, kind: output, shape index: {}]  }
   0x1   :  { %v164_v0 = vld [vmem:[%s269_s0] sm:$0xff]  ;;  %s147_s10 = smov 127   ;;  %v172_v1 = vld [vmem:[%s269_s0 + $0x8] sm:$0xff]  ;;  %s148_s13 = smov 15  }
   0x2   :  { %24 = vrot.lane.b32.xlu1 %v164_v0, %s145_s8  ;;  %15 = vrot.lane.b32.xlu0 %v164_v0, %s146_s9  ;;  %s149_s14 = smov 16   ;;  %v181_v3 = vand.u32 127, %v10_v2  ;;  %s150_s0 = smov 112   ;;  %v193_v25 = vmul.f32 -2.0, %v172_v1  ;;  %v196_v26 = vmul.f32 -2.0, %v164_v0 }
   0x3   :  { %55 = vrot.lane.b32.xlu2 %v164_v0, %s147_s10 }
   0x4   :  { %v12_v4 = vadd.s32 128, %v181_v3  ;;  %v13_v8 = vand.u32 15, %v181_v3  ;;  %vm28_vm0 = vcmp.lt.s32.totalorder %v181_v3, 113  ;;  %vm19_vm1 = vcmp.lt.s32.totalorder %v181_v3, 1 }
   0x5   :  { %vm59_vm4 = vcmp.lt.s32.totalorder %v181_v3, 127  ;;  %vm68_vm5 = vcmp.lt.s32.totalorder %v181_v3, 15  ;;  %vm48_vm8 = vcmp.lt.s32.totalorder %v181_v3, 112  ;;  %vm37_vm9 = vcmp.lt.s32.totalorder %v181_v3, 16 }
   0x6   :  { %v14_v9 = vand.u32 15, %v12_v4  ;;  %vm22_vm2 = vcmp.lt.s32.totalorder %v13_v8, 1  ;;  %vm62_vm6 = vcmp.ge.s32.totalorder %v13_v8, 15 }
   0x8   :  { %vm23_vm3 = vcmp.lt.s32.totalorder %v14_v9, 1  ;;  %vm63_vm7 = vcmp.ge.s32.totalorder %v14_v9, 15 }
   0xa   :  { %26 = vrot.lane.b32.xlu1 %v172_v1, %s145_s8  ;;  %17 = vrot.lane.b32.xlu0 %v172_v1, %s146_s9 }
   0xb   :  { %57 = vrot.lane.b32.xlu2 %v172_v1, %s147_s10 }
  0x12   :  { %66 = vrot.lane.b32.xlu1 %v172_v1, %s148_s13  ;;  %64 = vrot.lane.b32.xlu0 %v164_v0, %s148_s13 }
  0x1a   :  { %99 = vrot.lane.b32.xlu1 %v164_v0, %s149_s14 }
  0x5d   :  { %v56_v7 = vpop.permute.xlu2 %55 }
  0x65   :  { %v58_v18 = vpop.permute.xlu2 %57 }
  0x66   :  { %v60_v19 = vsel %vm59_vm4, %v56_v7, %v58_v18  ;;  %v61_v20 = vsel %vm59_vm4, %v58_v18, %v56_v7 }
  0x74   :  { %v25_v5 = vpop.permute.xlu1 %24  ;;  %v16_v6 = vpop.permute.xlu0 %15 }
  0x7c   :  { %v27_v10 = vpop.permute.xlu1 %26  ;;  %v18_v11 = vpop.permute.xlu0 %17 }
  0x7d   :  { %v29_v12 = vsel %vm28_vm0, %v25_v5, %v27_v10  ;;  %v30_v13 = vsel %vm28_vm0, %v27_v10, %v25_v5  ;;  %v20_v14 = vsel %vm19_vm1, %v16_v6, %v18_v11  ;;  %v21_v15 = vsel %vm19_vm1, %v18_v11, %v16_v6 }
  0x7e   :  { %v31_v16 = vsel %vm22_vm2, %v29_v12, %v21_v15  ;;  %v32_v17 = vsel %vm23_vm3, %v30_v13, %v20_v14 }
  0x7f   :  { %44 = vrot.lane.b32.xlu1 %v31_v16, %s150_s0  ;;  %33 = vrot.lane.b32.xlu2 %v31_v16, %s149_s14  ;;  %v42_v27 = vmul.f32 -0.5, %v31_v16  ;;  %v43_v28 = vmul.f32 -0.5, %v32_v17 }
  0x80   :  { %35 = vrot.lane.b32.xlu0 %v32_v17, %s149_s14 }
  0x84   :  { %v67_v21 = vpop.permute.xlu1 %66  ;;  %v65_v22 = vpop.permute.xlu0 %64 }
  0x85   :  { %v69_v23 = vsel %vm68_vm5, %v65_v22, %v67_v21  ;;  %v70_v24 = vsel %vm68_vm5, %v67_v21, %v65_v22 }
  0x86   :  { %v71_v29 = vsel %vm62_vm6, %v70_v24, %v60_v19  ;;  %v72_v30 = vsel %vm63_vm7, %v69_v23, %v61_v20 }
  0x87   :  { %46 = vrot.lane.b32.xlu2 %v32_v17, %s150_s0  ;;  %v83_v31 = vmul.f32 0.5, %v71_v29  ;;  %v87_v32 = vadd.f32 %v71_v29, %v31_v16  ;;  %75 = vrot.lane.b32.xlu1 %v72_v30, %s149_s14  ;;  %v84_v33 = vmul.f32 0.5, %v72_v30  ;;  %v88_v34 = vadd.f32 %v72_v30, %v32_v17 }
  0x88   :  { %73 = vrot.lane.b32.xlu0 %v71_v29, %s149_s14 }
  0x89   :  { %v85_v35 = vadd.f32 %v83_v31, %v42_v27  ;;  %v86_v36 = vadd.f32 %v84_v33, %v43_v28  ;;  %v109_v37 = vadd.f32 %v196_v26, %v87_v32  ;;  %v110_v38 = vadd.f32 %v193_v25, %v88_v34 }
  0x8b   :  { %125 = vst [vmem:[%s270_s1] sm:$0xff] %v85_v35 }
  0x8c   :  { %126 = vst [vmem:[%s270_s1 + $0x8] sm:$0xff] %v86_v36  ;;  %v100_v40 = vpop.permute.xlu1 %99 }
  0x8d   :  { %129 = vst [vmem:[%s270_s1 + $0x20] sm:$0xff] %v109_v37 }
  0x8e   :  { %130 = vst [vmem:[%s270_s1 + $0x28] sm:$0xff] %v110_v38 }
  0x8f   :  { %89 = vrot.lane.b32.xlu2 %v71_v29, %s150_s0  ;;  %115 = vrot.lane.b32.xlu1 %v172_v1, %s150_s0 }
  0x90   :  { %91 = vrot.lane.b32.xlu0 %v72_v30, %s150_s0 }
  0x97   :  { %101 = vrot.lane.b32.xlu2 %v172_v1, %s149_s14 }
  0x98   :  { %113 = vrot.lane.b32.xlu0 %v164_v0, %s150_s0 }
  0xd9   :  { %v34_v39 = vpop.permute.xlu2 %33 }
  0xe1   :  { %v47_v41 = vpop.permute.xlu2 %46 }
  0xe9   :  { %v90_v44 = vpop.permute.xlu2 %89 }
  0xf1   :  { %v45_v42 = vpop.permute.xlu1 %44  ;;  %v102_v0 = vpop.permute.xlu2 %101 }
  0xf2   :  { %v36_v43 = vpop.permute.xlu0 %35  ;;  %v49_v47 = vsel %vm48_vm8, %v45_v42, %v47_v41  ;;  %v50_v48 = vsel %vm48_vm8, %v47_v41, %v45_v42  ;;  %v103_v8 = vsel %vm37_vm9, %v100_v40, %v102_v0  ;;  %v104_v9 = vsel %vm37_vm9, %v102_v0, %v100_v40 }
  0xf3   :  { %v38_v49 = vsel %vm37_vm9, %v34_v39, %v36_v43  ;;  %v39_v50 = vsel %vm37_vm9, %v36_v43, %v34_v39  ;;  %v51_v53 = vmul.f32 -0.25, %v49_v47  ;;  %v52_v54 = vmul.f32 -0.25, %v50_v48 }
  0xf4   :  { %v40_v55 = vmul.f32 0.25, %v39_v50  ;;  %v41_v56 = vmul.f32 0.25, %v38_v49  ;;  %v111_v11 = vadd.f32 %v196_v26, %v104_v9  ;;  %v112_v12 = vadd.f32 %v193_v25, %v103_v8 }
  0xf5   :  { %v105_v14 = vmul.f32 -0.5, %v104_v9  ;;  %v106_v15 = vmul.f32 -0.5, %v103_v8 }
  0xf6   :  { %v53_v59 = vadd.f32 %v51_v53, %v40_v55  ;;  %v54_v60 = vadd.f32 %v52_v54, %v41_v56 }
  0xf9   :  { %v76_v45 = vpop.permute.xlu1 %75 }
  0xfa   :  { %v74_v46 = vpop.permute.xlu0 %73 }
  0xfb   :  { %v77_v51 = vsel %vm37_vm9, %v74_v46, %v76_v45  ;;  %v78_v52 = vsel %vm37_vm9, %v76_v45, %v74_v46 }
  0xfc   :  { %v79_v57 = vmul.f32 -0.25, %v78_v52  ;;  %v80_v58 = vmul.f32 -0.25, %v77_v51 }
  0xfe   :  { %v81_v1 = vadd.f32 %v79_v57, %v53_v59  ;;  %v82_v2 = vadd.f32 %v80_v58, %v54_v60 }
 0x101   :  { %v116_v10 = vpop.permute.xlu1 %115 }
 0x102   :  { %v92_v61 = vpop.permute.xlu0 %91 }
 0x103   :  { %v93_v62 = vsel %vm48_vm8, %v90_v44, %v92_v61  ;;  %v94_v63 = vsel %vm48_vm8, %v92_v61, %v90_v44 }
 0x104   :  { %v95_v4 = vmul.f32 0.25, %v93_v62  ;;  %v96_v5 = vmul.f32 0.25, %v94_v63 }
 0x106   :  { %v97_v6 = vadd.f32 %v95_v4, %v81_v1  ;;  %v98_v7 = vadd.f32 %v96_v5, %v82_v2 }
 0x108   :  { %131 = vst [vmem:[%s270_s1 + $0x30] sm:$0xff] %v97_v6 }
 0x109   :  { %132 = vst [vmem:[%s270_s1 + $0x38] sm:$0xff] %v98_v7 }
 0x10a   :  { %v114_v13 = vpop.permute.xlu0 %113 }
 0x10b   :  { %v117_v16 = vsel %vm48_vm8, %v114_v13, %v116_v10  ;;  %v118_v17 = vsel %vm48_vm8, %v116_v10, %v114_v13 }
 0x10c   :  { %v119_v18 = vmul.f32 0.5, %v117_v16  ;;  %v120_v19 = vmul.f32 0.5, %v118_v17  ;;  %v123_v20 = vadd.f32 %v117_v16, %v111_v11  ;;  %v124_v21 = vadd.f32 %v118_v17, %v112_v12 }
 0x10e   :  { %v121_v22 = vadd.f32 %v119_v18, %v105_v14  ;;  %v122_v23 = vadd.f32 %v120_v19, %v106_v15  ;;  %133 = vst [vmem:[%s270_s1 + $0x40] sm:$0xff] %v123_v20 }
 0x10f   :  { %134 = vst [vmem:[%s270_s1 + $0x48] sm:$0xff] %v124_v21 }
 0x110   :  { %127 = vst [vmem:[%s270_s1 + $0x10] sm:$0xff] %v121_v22 }
 0x111   :  { %128 = vst [vmem:[%s270_s1 + $0x18] sm:$0xff] %v122_v23 }

</bundles_post_ra>
